<compile_context>
chip_gen: v7x
topology: tpu7x:2x2x1
jax: 0.10.0
libtpu: 0.0.40
codegen_flags: <defaults>
</compile_context>

<pallas_src>
import math

import jax
import jax.numpy as jnp
from jax.experimental import pallas as pl
from jax.experimental.pallas import tpu as pltpu


def _round_up(x, m):
    return (x + m - 1) // m * m


def _cdiv(a, b):
    return -(-a // b)


def _vmem_budget_bytes():
    """Generation-dependent VMEM budget/limit (64 MiB on v7x, 128 MiB v5e/v6e)."""
    phys = 64 * 1024 * 1024  # conservative default == smallest (v7x) per-TC VMEM
    try:
        info = pltpu.get_tpu_info()
        phys = int(getattr(info, "vmem_capacity_bytes", phys))
    except Exception:
        pass
    return int(phys * 0.65), int(phys * 0.75)


def _num_tensorcores():
    """Best-effort TensorCores-per-device (2 on v7x/v4/v5p style chips)."""
    try:
        dev = jax.devices()[0]
        nc = getattr(dev, "num_cores", None)
        if nc:
            return int(nc)
        kind = str(getattr(dev, "device_kind", "")).lower()
        if any(tag in kind for tag in ("v7", "v5p", "v4")):
            return 2
    except Exception:
        pass
    return 1


def _vmem_bytes(tile_n, tile_m, dp):
    # Conservative: assume every block is double-buffered (pl.Buffered(1) on
    # the resident blocks only reduces this).
    return (2 * tile_n * tile_m            # int8 H-mask tile
            + 2 * tile_m * dp * 4          # E tile (f32)
            + 2 * tile_n * 4               # exp_s1 tile
            + 2 * tile_m * 4               # exp_s2 tile
            + 2 * tile_n * dp * 4          # output tile
            + tile_n * dp * 4              # scratch accumulator
            + tile_n * 4)                  # scratch denominator


def hga_kernel(h_ref, e_ref, s1_ref, s2_ref, out_ref, acc_ref, den_ref):
    # h_ref : (TN, TM) int8  0/1 mask of stored (node, edge) entries
    # e_ref : (TM, Dp) f32   hyperedge features (zero-padded rows/cols)
    # s1_ref: (TN, 1)  f32   exp(X_i . a[:D])
    # s2_ref: (1, TM)  f32   exp(E_j . a[D:])  (zero on padded edges)
    j = pl.program_id(1)

    @pl.when(j == 0)
    def _init():
        acc_ref[...] = jnp.zeros_like(acc_ref)
        den_ref[...] = jnp.zeros_like(den_ref)

    # exp(s1_i + s2_j) == exp(s1_i) * exp(s2_j): pure VPU multiplies, no EUP.
    p = h_ref[...].astype(jnp.float32) * s1_ref[...] * s2_ref[...]   # (TN, TM)
    den_ref[...] += jnp.sum(p, axis=-1, keepdims=True)               # (TN, 1)
    acc_ref[...] += jnp.dot(p, e_ref[...],
                            preferred_element_type=jnp.float32)      # (TN, Dp) MXU

    @pl.when(j == pl.num_programs(1) - 1)
    def _finalize():
        inv = pl.reciprocal(den_ref[...] + 1e-16, approx=True)       # EUP
        out_ref[...] = (acc_ref[...] * inv).astype(out_ref.dtype)


def hypergraph_attention(H, X, a, *, tile_n=512):
    N, M = H.shape
    Nx, D = X.shape
    assert Nx == N and a.shape == (2 * D, 1)

    f32 = jnp.float32
    H = H.astype(f32)
    X = X.astype(f32)
    a = a.astype(f32)

    # ---- Prologue hoisted out of the kernel (plain XLA) ----
    E = jnp.dot(H.T, X, preferred_element_type=f32)              # (M, D)
    s1 = jnp.dot(X, a[:D], preferred_element_type=f32)           # (N, 1)
    s2 = jnp.dot(E, a[D:], preferred_element_type=f32)           # (M, 1)
    exp_s1 = jnp.exp(s1)                                         # (N, 1)
    exp_s2 = jnp.exp(s2).reshape(1, M)                           # (1, M)
    h_mask = (H != 0.0).astype(jnp.int8)                         # (N, M)

    # ---- Tile selection ----
    Dp = _round_up(D, 128)
    Mp = _round_up(M, 128)
    budget, vmem_limit = _vmem_budget_bytes()

    # Node tile: multiple of 32 (int8 sublane packing); leave >= 2 grid steps
    # per TensorCore (>= 4 total on 2-TC chips) when N allows.
    min_steps = 2 * _num_tensorcores()
    tile_cap = max(32, _round_up(_cdiv(N, min_steps), 32))
    tile_n = max(32, min(tile_n, tile_cap))
    tile_n -= tile_n % 32

    # Edge chunk: start fully resident, shrink node tile first, then chunk M.
    tile_m = Mp
    while tile_n > 32 and _vmem_bytes(tile_n, tile_m, Dp) > budget:
        tile_n = max(32, (tile_n // 2) - (tile_n // 2) % 32)
    while tile_m > 128 and _vmem_bytes(tile_n, tile_m, Dp) > budget:
        tile_m = max(128, _round_up(tile_m // 2, 128))

    Mp = _round_up(M, tile_m)          # multiple of tile_m (and of 128)
    Np = _round_up(N, tile_n)

    # ---- Padding (all pad regions contribute exactly zero) ----
    E = jnp.pad(E, ((0, Mp - M), (0, Dp - D)))
    exp_s2 = jnp.pad(exp_s2, ((0, 0), (0, Mp - M)))
    h_mask = jnp.pad(h_mask, ((0, Np - N), (0, Mp - M)))
    exp_s1 = jnp.pad(exp_s1, ((0, Np - N), (0, 0)))

    n_tiles = Np // tile_n
    m_tiles = Mp // tile_m

    # Resident (constant-index) E / exp_s2 blocks: single-buffer them when they
    # are big enough for double-buffering to matter (most important on v7x's
    # 64 MiB VMEM).  Small blocks keep the default (no behavior change).
    res_kwargs = {}
    if m_tiles == 1 and 2 * (tile_m * Dp + tile_m) * 4 > (4 << 20):
        res_kwargs["pipeline_mode"] = pl.Buffered(1)

    cost = pl.CostEstimate(
        flops=2 * Np * Mp * Dp + 3 * Np * Mp,
        transcendentals=0,
        bytes_accessed=int(
            Np * Mp                                             # int8 H mask
            + (1 if m_tiles == 1 else n_tiles) * Mp * (Dp + 1) * 4  # E + exp_s2
            + Np * 4                                            # exp_s1
            + Np * Dp * 4                                       # output
        ),
    )

    out = pl.pallas_call(
        hga_kernel,
        out_shape=jax.ShapeDtypeStruct((Np, Dp), f32),
        grid_spec=pltpu.PrefetchScalarGridSpec(
            num_scalar_prefetch=0,
            grid=(n_tiles, m_tiles),
            in_specs=[
                pl.BlockSpec((tile_n, tile_m), lambda i, j: (i, j)),              # H mask
                pl.BlockSpec((tile_m, Dp), lambda i, j: (j, 0), **res_kwargs),    # E
                pl.BlockSpec((tile_n, 1), lambda i, j: (i, 0)),                   # exp_s1
                pl.BlockSpec((1, tile_m), lambda i, j: (0, j), **res_kwargs),     # exp_s2
            ],
            out_specs=pl.BlockSpec((tile_n, Dp), lambda i, j: (i, 0)),
            scratch_shapes=[
                pltpu.VMEM((tile_n, Dp), f32),   # accumulator
                pltpu.VMEM((tile_n, 1), f32),    # denominator
            ],
        ),
        compiler_params=pltpu.CompilerParams(
            dimension_semantics=("parallel", "arbitrary"),
            vmem_limit_bytes=vmem_limit,
        ),
        cost_estimate=cost,
    )(h_mask, E, exp_s1, exp_s2)

    return out[:N, :D]


def reference(H, X, a):
    # pure-JAX dense equivalent of the PyTorch sparse forward
    D = X.shape[1]
    E = H.T @ X
    s1 = X @ a[:D, 0]
    s2 = E @ a[D:, 0]
    e = s1[:, None] + s2[None, :]
    mask = H != 0.0
    e_exp = jnp.where(mask, jnp.exp(e), 0.0)
    denom = e_exp.sum(-1, keepdims=True) + 1e-16
    alpha = e_exp / denom
    return alpha @ E


if __name__ == "__main__":
    # in_dim == out_dim == D is required by forward's `concat @ a` to typecheck.
    N, M, D = 256, 64, 16
    key = jax.random.PRNGKey(0)
    k_mask, k_val, k_x, k_a, k_w = jax.random.split(key, 5)

    # sparse incidence pattern, ~30% density, positive values on stored entries
    mask = jax.random.bernoulli(k_mask, 0.3, (N, M))
    vals = jax.random.uniform(k_val, (N, M), minval=0.5, maxval=1.5)
    H = jnp.where(mask, vals, 0.0).astype(jnp.float32)

    X = (jax.random.normal(k_x, (N, D)) * 0.1).astype(jnp.float32)

    # xavier_uniform_ for a (shape (2*out_dim, 1)): bound = sqrt(6/(fan_in+fan_out))
    bound_a = math.sqrt(6.0 / (1 + 2 * D))
    a = jax.random.uniform(k_a, (2 * D, 1), minval=-bound_a,
                           maxval=bound_a).astype(jnp.float32)

    # W (out_dim, in_dim) exists in __init__ but is unused in forward; kept for parity.
    bound_w = math.sqrt(6.0 / (D + D))
    W = jax.random.uniform(k_w, (D, D), minval=-bound_w,
                           maxval=bound_w).astype(jnp.float32)

    out = jax.block_until_ready(hypergraph_attention(H, X, a))
    ref = reference(H, X, a)
    assert out.shape == (N, D) and out.dtype == jnp.float32
    # approx reciprocal (EUP) + exp factorization introduce tiny relative error
    assert jnp.allclose(out, ref, atol=2e-3, rtol=2e-2), \
        float(jnp.max(jnp.abs(out - ref)))
    print("KERNEL_OK")
</pallas_src>

<mosaic_0001>
module attributes {stable_mosaic.version = 11 : i64} {
  func.func @hga_kernel(%arg0: i32, %arg1: i32, %arg2: memref<128x128xi8, #tpu.memory_space<vmem>>, %arg3: memref<128x128xf32, #tpu.memory_space<vmem>>, %arg4: memref<128x1xf32, #tpu.memory_space<vmem>>, %arg5: memref<1x128xf32, #tpu.memory_space<vmem>>, %arg6: memref<128x128xf32, #tpu.memory_space<vmem>>, %arg7: memref<128x128xf32, #tpu.memory_space<vmem>>, %arg8: memref<128x1xf32, #tpu.memory_space<vmem>>) attributes {dimension_semantics = [#tpu.dimension_semantics<parallel>, #tpu.dimension_semantics<arbitrary>], iteration_bounds = array<i64: 2, 1>, scalar_prefetch = 0 : i64, scratch_operands = 2 : i64, tpu.core_type = #tpu.core_type<tc>, window_params = [{transform_indices = @transform_0, window_bounds = array<i64: 128, 128>}, {transform_indices = @transform_1, window_bounds = array<i64: 128, 128>}, {transform_indices = @transform_2, window_bounds = array<i64: 128, 1>}, {transform_indices = @transform_3, window_bounds = array<i64: 1, 128>}, {transform_indices = @transform_4, window_bounds = array<i64: 128, 128>}]} {
    %c0_i32 = arith.constant 0 : i32
    %0 = arith.cmpi eq, %arg1, %c0_i32 : i32
    %1 = arith.extui %0 : i1 to i32
    %c0_i32_0 = arith.constant 0 : i32
    %2 = arith.cmpi ne, %1, %c0_i32_0 : i32
    scf.if %2 {
      %cst_19 = arith.constant 0.000000e+00 : f32
      %24 = vector.broadcast %cst_19 : f32 to vector<128x128xf32>
      %c0_20 = arith.constant 0 : index
      %c0_21 = arith.constant 0 : index
      %25 = vector.load %arg7[%c0_20, %c0_21] : memref<128x128xf32, #tpu.memory_space<vmem>>, vector<128x128xf32>
      tpu.vector_store %arg7[%c0_20, %c0_21], %24 {strides = array<i32>} : memref<128x128xf32, #tpu.memory_space<vmem>>, vector<128x128xf32>,
      %cst_22 = arith.constant 0.000000e+00 : f32
      %26 = vector.broadcast %cst_22 : f32 to vector<128x1xf32>
      %c0_23 = arith.constant 0 : index
      %c0_24 = arith.constant 0 : index
      %27 = vector.load %arg8[%c0_23, %c0_24] : memref<128x1xf32, #tpu.memory_space<vmem>>, vector<128x1xf32>
      tpu.vector_store %arg8[%c0_23, %c0_24], %26 {strides = array<i32>} : memref<128x1xf32, #tpu.memory_space<vmem>>, vector<128x1xf32>,
    } else {
    }
    %c0 = arith.constant 0 : index
    %c0_1 = arith.constant 0 : index
    %3 = vector.load %arg2[%c0, %c0_1] : memref<128x128xi8, #tpu.memory_space<vmem>>, vector<128x128xi8>
    %4 = arith.sitofp %3 : vector<128x128xi8> to vector<128x128xf32>
    %c0_2 = arith.constant 0 : index
    %c0_3 = arith.constant 0 : index
    %5 = vector.load %arg4[%c0_2, %c0_3] : memref<128x1xf32, #tpu.memory_space<vmem>>, vector<128x1xf32>
    %6 = vector.broadcast %5 : vector<128x1xf32> to vector<128x128xf32>
    %7 = arith.mulf %4, %6 : vector<128x128xf32>
    %c0_4 = arith.constant 0 : index
    %c0_5 = arith.constant 0 : index
    %8 = vector.load %arg5[%c0_4, %c0_5] : memref<1x128xf32, #tpu.memory_space<vmem>>, vector<1x128xf32>
    %9 = vector.broadcast %8 : vector<1x128xf32> to vector<128x128xf32>
    %10 = arith.mulf %7, %9 : vector<128x128xf32>
    %c0_6 = arith.constant 0 : index
    %c0_7 = arith.constant 0 : index
    %11 = vector.load %arg8[%c0_6, %c0_7] : memref<128x1xf32, #tpu.memory_space<vmem>>, vector<128x1xf32>
    %cst = arith.constant dense<0.000000e+00> : vector<128xf32>
    %12 = vector.multi_reduction <add>, %10, %cst [1] : vector<128x128xf32> to vector<128xf32>
    %13 = vector.shape_cast %12 : vector<128xf32> to vector<128x1xf32>
    %14 = arith.addf %11, %13 : vector<128x1xf32>
    %c0_8 = arith.constant 0 : index
    %c0_9 = arith.constant 0 : index
    %15 = vector.load %arg8[%c0_8, %c0_9] : memref<128x1xf32, #tpu.memory_space<vmem>>, vector<128x1xf32>
    tpu.vector_store %arg8[%c0_8, %c0_9], %14 {strides = array<i32>} : memref<128x1xf32, #tpu.memory_space<vmem>>, vector<128x1xf32>,
    %c0_10 = arith.constant 0 : index
    %c0_11 = arith.constant 0 : index
    %16 = vector.load %arg7[%c0_10, %c0_11] : memref<128x128xf32, #tpu.memory_space<vmem>>, vector<128x128xf32>
    %c0_12 = arith.constant 0 : index
    %c0_13 = arith.constant 0 : index
    %17 = vector.load %arg3[%c0_12, %c0_13] : memref<128x128xf32, #tpu.memory_space<vmem>>, vector<128x128xf32>
    %cst_14 = arith.constant dense<0.000000e+00> : vector<128x128xf32>
    %18 = tpu.matmul %10, %17, %cst_14 {dimension_numbers = #tpu.dot_dimension_numbers<[1], [0], [0], [1], [0, 0, 1, 1], [], []>} : vector<128x128xf32>, vector<128x128xf32>, vector<128x128xf32> -> vector<128x128xf32>
    %19 = arith.addf %16, %18 : vector<128x128xf32>
    %c0_15 = arith.constant 0 : index
    %c0_16 = arith.constant 0 : index
    %20 = vector.load %arg7[%c0_15, %c0_16] : memref<128x128xf32, #tpu.memory_space<vmem>>, vector<128x128xf32>
    tpu.vector_store %arg7[%c0_15, %c0_16], %19 {strides = array<i32>} : memref<128x128xf32, #tpu.memory_space<vmem>>, vector<128x128xf32>,
    %c0_i32_17 = arith.constant 0 : i32
    %21 = arith.cmpi eq, %arg1, %c0_i32_17 : i32
    %22 = arith.extui %21 : i1 to i32
    %c0_i32_18 = arith.constant 0 : i32
    %23 = arith.cmpi ne, %22, %c0_i32_18 : i32
    scf.if %23 {
      %c0_19 = arith.constant 0 : index
      %c0_20 = arith.constant 0 : index
      %24 = vector.load %arg8[%c0_19, %c0_20] : memref<128x1xf32, #tpu.memory_space<vmem>>, vector<128x1xf32>
      %cst_21 = arith.constant 1.000000e-16 : f32
      %25 = vector.broadcast %cst_21 : f32 to vector<128x1xf32>
      %26 = arith.addf %24, %25 : vector<128x1xf32>
      %27 = tpu.reciprocal %26 {approx = true} : vector<128x1xf32> -> vector<128x1xf32>
      %c0_22 = arith.constant 0 : index
      %c0_23 = arith.constant 0 : index
      %28 = vector.load %arg7[%c0_22, %c0_23] : memref<128x128xf32, #tpu.memory_space<vmem>>, vector<128x128xf32>
      %29 = vector.broadcast %27 : vector<128x1xf32> to vector<128x128xf32>
      %30 = arith.mulf %28, %29 : vector<128x128xf32>
      %c0_24 = arith.constant 0 : index
      %c0_25 = arith.constant 0 : index
      %31 = vector.load %arg6[%c0_24, %c0_25] : memref<128x128xf32, #tpu.memory_space<vmem>>, vector<128x128xf32>
      tpu.vector_store %arg6[%c0_24, %c0_25], %30 {strides = array<i32>} : memref<128x128xf32, #tpu.memory_space<vmem>>, vector<128x128xf32>,
    } else {
    }
    return
  }
  func.func @transform_0(%arg0: i32, %arg1: i32) -> (i32, i32) {
    %c0_i32 = arith.constant 0 : i32
    return %arg0, %arg1 : i32, i32
  }
  func.func @transform_1(%arg0: i32, %arg1: i32) -> (i32, i32) {
    %c0_i32 = arith.constant 0 : i32
    %c0_i32_0 = arith.constant 0 : i32
    return %arg1, %c0_i32 : i32, i32
  }
  func.func @transform_2(%arg0: i32, %arg1: i32) -> (i32, i32) {
    %c0_i32 = arith.constant 0 : i32
    %c0_i32_0 = arith.constant 0 : i32
    return %arg0, %c0_i32 : i32, i32
  }
  func.func @transform_3(%arg0: i32, %arg1: i32) -> (i32, i32) {
    %c0_i32 = arith.constant 0 : i32
    %c0_i32_0 = arith.constant 0 : i32
    return %c0_i32, %arg1 : i32, i32
  }
  func.func @transform_4(%arg0: i32, %arg1: i32) -> (i32, i32) {
    %c0_i32 = arith.constant 0 : i32
    %c0_i32_0 = arith.constant 0 : i32
    return %arg0, %c0_i32 : i32, i32
  }
}

</mosaic_0001>

<bundles_post_ra>
// kernel: tpu_custom_call.1
= control target key start
LH: loop header
LB: loop body
LE: loop exit
PB: predicated region body
PF: predicated region fallthrough
CT: control target
= control target key end

     0   :  { %9 = vsyncpa [#allocation5], 0  ;;  %s1731_s0 = inlined_call_operand.vmem [shape: s8[256,128], index: 0, kind: input, shape index: {}]   ;;  %s1732_s1 = inlined_call_operand.vmem [shape: f32[128,128], index: 1, kind: input, shape index: {}]   ;;  %s1733_s2 = inlined_call_operand.vmem [shape: f32[256,1], index: 2, kind: input, shape index: {}]   ;;  %s1734_s3 = inlined_call_operand.vmem [shape: f32[1,128], index: 3, kind: input, shape index: {}]   ;;  %s1735_s4 = inlined_call_operand.hbm [shape: f32[256,128], index: 4, kind: output, shape index: {}]  }
   0x1   :  { %11 = vsyncpa [#allocation5 + $0x1], 0  ;;  %s1441_s15 = smov 0   ;;  %s1443_s16 = smov 0  }
   0x2   :  { %s1445_s17 = smov 0   ;;  %s1447_s18 = smov 0  }
   0x3   :  { %s1449_s19 = smov 0   ;;  %s1451_s20 = smov 0  }
   0x4 LB: > { %s1083_s21 = sadd.s32 4294967295, %s1409_s20   ;;  %s1084_s22 = sadd.s32 4294967294, %s1409_s20   ;;  %s1409_s20 = sphi %s1451_s20, %s17_s20   ;;  %s1405_s19 = sphi %s1449_s19, %s1742_s19   ;;  %s1401_s18 = sphi %s1447_s18, %s1741_s18   ;;  %s1397_s17 = sphi %s1445_s17, %s1740_s17   ;;  %s1393_s16 = sphi %s1443_s16, %s1739_s16   ;;  %s1389_s15 = sphi %s1441_s15, %s1738_s15  }
   0x5   : > { %s29_s23 = sadd.s32 1, %s1405_s19  ;;  %s142_s24 = sadd.s32 1, %s1397_s17 }
   0x6   : > { %p31_p0 = scmp.ge.s32.totalorder %s29_s23, 2  ;;  %p152_p1 = scmp.ne.s32.totalorder %s1397_s17, %s1393_s16 }
   0x7   : > { %p153_p2 = scmp.eq.s32.totalorder %s1083_s21, 1  ;;  %p158_p3 = scmp.ne.s32.totalorder %s1393_s16, %s1389_s15 }
   0x8   : > { %s1744_s23 = smov (%p31_p0, %s29_s23), 0  ;;  %p159_p5 = scmp.eq.s32.totalorder %s1084_s22, 1 }
   0x9   : > { %p1481_p4 = por %p153_p2, %p152_p1  ;;  %s139_s26 = ssub.s32 %s1405_s19, %s1744_s23 }
   0xa   : > { %p1089_p6 = scmp.ge.s32.totalorder %s1409_s20, 1  ;;  %p140_p7 = scmp.eq.s32.totalorder %s139_s26, 0 }
   0xb   : > { %p1488_p8 = por %p159_p5, %p158_p3  ;;  %p213_p9 = scmp.lt.s32.totalorder %s1409_s20, 3 }
   0xc   : > { %s1494_s28 = scalar_select %p140_p7, %s1397_s17, %s142_s24  }
   0xd   : > { %p214_p10 = pnand %p1089_p6, %p213_p9 }
   0xe   : > { %s1093_s29 = sshll.u32 (!%p214_p10), %s1401_s18, 4  ;;  %v585_v0 = vld [vmem:[%s1732_s1] sm:$0xff] (!%p214_p10)  ;;  %v586_v1 = vld [vmem:[%s1732_s1 + $0x8] sm:$0xff] (!%p214_p10)  ;;  %v587_v2 = vld [vmem:[%s1732_s1 + $0x10] sm:$0xff] (!%p214_p10)  ;;  %v1411_v3 = vmov (!%p214_p10), 0   ;;  %vm300_vm0 = vcmask (!%p214_p10), 7168  }
   0xf   : > { %217 = sbr.rel (%p214_p10) target bundleno = 513 (0x201), region = 36  ;;  %1298 = vset.pattern.permute.xlu1 (!%p214_p10), %v1411_v3  ;;  %1297 = vset.pattern.permute.xlu0 (!%p214_p10), %v1411_v3  ;;  %p271_p11 = scmp.lt.s32.totalorder (!%p214_p10), %s1093_s29, 31  ;;  %v1190_v4 = vpack.c.bf16 (!%p214_p10), %v586_v1, %v585_v0  ;;  %v588_v5 = vld [vmem:[%s1732_s1 + $0x18] sm:$0xff] (!%p214_p10)  ;;  %v589_v7 = vld [vmem:[%s1732_s1 + $0x20] sm:$0xff] (!%p214_p10)  ;;  %v590_v8 = vld [vmem:[%s1732_s1 + $0x28] sm:$0xff] (!%p214_p10)  ;;  %v1412_v41 = vmov (!%p214_p10), 0.0  }
  0x10   : > { %v1194_v6 = vpack.c.bf16 (!%p214_p10), %v588_v5, %v587_v2  ;;  %v1198_v9 = vpack.c.bf16 (!%p214_p10), %v590_v8, %v589_v7  ;;  %v591_v10 = vld [vmem:[%s1732_s1 + $0x30] sm:$0xff] (!%p214_p10)  ;;  %v592_v13 = vld [vmem:[%s1732_s1 + $0x38] sm:$0xff] (!%p214_p10)  ;;  %v593_v17 = vld [vmem:[%s1732_s1 + $0x40] sm:$0xff] (!%p214_p10)  ;;  %302 = vst.msk [vmem:[#allocation3 + $0x8] sm:$0xff] (!%p214_p10), %vm300_vm0, %v1412_v41  ;;  %s252_s21 = sand.u32 (!%p214_p10), 1, %s1393_s16   ;;  %s1101_s26 = sshll.u32 (!%p214_p10), %s1401_s18, 11 }
  0x11   : > { %1191 = vmatprep.subr.bf16.mxu0 (!%p214_p10), %v1190_v4  ;;  %1222 = vmatprep.subr.bf16.mxu1 (!%p214_p10), %v1190_v4  ;;  %v1202_v16 = vpack.c.bf16 (!%p214_p10), %v592_v13, %v591_v10  ;;  %v594_v18 = vld [vmem:[%s1732_s1 + $0x48] sm:$0xff] (!%p214_p10)  ;;  %v595_v22 = vld [vmem:[%s1732_s1 + $0x50] sm:$0xff] (!%p214_p10)  ;;  %v596_v23 = vld [vmem:[%s1732_s1 + $0x58] sm:$0xff] (!%p214_p10)  ;;  %301 = vst.msk [vmem:[#allocation3] sm:$0xff] (!%p214_p10), %vm300_vm0, %v1412_v41  ;;  %s1678_s7 = scalar_lea.hbm (!%p214_p10), %s1735_s4, %s1101_s26  ;;  %s1685_s8 = scalar_lea.sflag (!%p214_p10), [#allocation5], %s252_s21 }
  0x12   : > { %1193 = vmatpush3.bf16.msra.mxu0 (!%p214_p10), %v1190_v4  ;;  %1230 = vmatpush3.bf16.msra.mxu1 (!%p214_p10), %v1190_v4  ;;  %v1206_v21 = vpack.c.bf16 (!%p214_p10), %v594_v18, %v593_v17  ;;  %v1210_v26 = vpack.c.bf16 (!%p214_p10), %v596_v23, %v595_v22  ;;  %v597_v27 = vld [vmem:[%s1732_s1 + $0x60] sm:$0xff] (!%p214_p10)  ;;  %v598_v28 = vld [vmem:[%s1732_s1 + $0x68] sm:$0xff] (!%p214_p10)  ;;  %v599_v32 = vld [vmem:[%s1732_s1 + $0x70] sm:$0xff] (!%p214_p10)  ;;  %303 = vst.msk [vmem:[#allocation3 + $0x10] sm:$0xff] (!%p214_p10), %vm300_vm0, %v1412_v41 }
  0x13   : > { %1195 = vmatprep.subr.bf16.mxu0 (!%p214_p10), %v1194_v6  ;;  %1223 = vmatprep.subr.bf16.mxu1 (!%p214_p10), %v1194_v6  ;;  %v1214_v31 = vpack.c.bf16 (!%p214_p10), %v598_v28, %v597_v27  ;;  %v600_v33 = vld [vmem:[%s1732_s1 + $0x78] sm:$0xff] (!%p214_p10)  ;;  %304 = vst.msk [vmem:[#allocation3 + $0x18] sm:$0xff] (!%p214_p10), %vm300_vm0, %v1412_v41  ;;  %305 = vst.msk [vmem:[#allocation3 + $0x20] sm:$0xff] (!%p214_p10), %vm300_vm0, %v1412_v41  ;;  %v1593_v52 = vld [vmem:[%s1734_s3] ss:$0 sm:$0xff] (!%p214_p10) }
  0x14   : > { %v1218_v36 = vpack.c.bf16 (!%p214_p10), %v600_v33, %v599_v32  ;;  %306 = vst.msk [vmem:[#allocation3 + $0x28] sm:$0xff] (!%p214_p10), %vm300_vm0, %v1412_v41  ;;  %307 = vst.msk [vmem:[#allocation3 + $0x30] sm:$0xff] (!%p214_p10), %vm300_vm0, %v1412_v41 }
  0x15   : > { %308 = vst.msk [vmem:[#allocation3 + $0x38] sm:$0xff] (!%p214_p10), %vm300_vm0, %v1412_v41  ;;  %309 = vst.msk [vmem:[#allocation3 + $0x40] sm:$0xff] (!%p214_p10), %vm300_vm0, %v1412_v41 }
  0x16   : > { %s1746_s29 = smov (!%p271_p11, %s1093_s29), 31  ;;  %1197 = vmatpush3.bf16.msra.mxu0 %v1194_v6  ;;  %1231 = vmatpush3.bf16.msra.mxu1 %v1194_v6  ;;  %310 = vst.msk [vmem:[#allocation3 + $0x48] sm:$0xff] %vm300_vm0, %v1412_v41  ;;  %311 = vst.msk [vmem:[#allocation3 + $0x50] sm:$0xff] %vm300_vm0, %v1412_v41 }
  0x17   : > { %s1094_s22 = sshll.u32 %s1746_s29, 3  ;;  %1199 = vmatprep.subr.bf16.mxu0 %v1198_v9  ;;  %1224 = vmatprep.subr.bf16.mxu1 %v1198_v9  ;;  %312 = vst.msk [vmem:[#allocation3 + $0x58] sm:$0xff] %vm300_vm0, %v1412_v41  ;;  %313 = vst.msk [vmem:[#allocation3 + $0x60] sm:$0xff] %vm300_vm0, %v1412_v41 }
  0x18   : > { %s1518_s30 = scalar_lea.vmem %s1733_s2, %s1094_s22  ;;  %314 = vst.msk [vmem:[#allocation3 + $0x68] sm:$0xff] %vm300_vm0, %v1412_v41  ;;  %315 = vst.msk [vmem:[#allocation3 + $0x70] sm:$0xff] %vm300_vm0, %v1412_v41  ;;  %s1090_s22 = sshll.u32 %s252_s21, 7 }
  0x19   : > { %v354_v11 = vld [vmem:[%s1518_s30 + $0x8] sm:$0xff]  ;;  %v353_v12 = vld [vmem:[%s1518_s30] sm:$0xff]  ;;  %v363_v19 = vld [vmem:[%s1518_s30 + $0x50] sm:$0xff]  ;;  %316 = vst.msk [vmem:[#allocation3 + $0x78] sm:$0xff] %vm300_vm0, %v1412_v41  ;;  %s1656_s24 = scalar_lea.vmem [#allocation4], %s1090_s22 }
  0x1a   : > { %376 = vperm.xlu1 %1298, %v354_v11   ;;  %371 = vperm.xlu0 %1297, %v353_v12   ;;  %v362_v14 = vld [vmem:[%s1518_s30 + $0x48] sm:$0xff]  ;;  %v361_v15 = vld [vmem:[%s1518_s30 + $0x40] sm:$0xff]  ;;  %v355_v20 = vld [vmem:[%s1518_s30 + $0x10] sm:$0xff]  ;;  %s971_s5 = sshll.u32 %s1656_s24, 4  ;;  %s1680_s5 = int_to_ptr.vmem [resolvable:$true] %s971_s5 }
  0x1b   : > { %1201 = vmatpush3.bf16.msra.mxu0 %v1198_v9  ;;  %1232 = vmatpush3.bf16.msra.mxu1 %v1198_v9  ;;  %v364_v24 = vld [vmem:[%s1518_s30 + $0x58] sm:$0xff]  ;;  %v365_v29 = vld [vmem:[%s1518_s30 + $0x60] sm:$0xff]  ;;  %v366_v34 = vld [vmem:[%s1518_s30 + $0x68] sm:$0xff] }
  0x1c   : > { %1203 = vmatprep.subr.bf16.mxu0 %v1202_v16  ;;  %1225 = vmatprep.subr.bf16.mxu1 %v1202_v16  ;;  %v356_v25 = vld [vmem:[%s1518_s30 + $0x18] sm:$0xff]  ;;  %v357_v30 = vld [vmem:[%s1518_s30 + $0x20] sm:$0xff]  ;;  %v358_v35 = vld [vmem:[%s1518_s30 + $0x28] sm:$0xff] }
  0x1d   : > { %v367_v37 = vld [vmem:[%s1518_s30 + $0x70] sm:$0xff]  ;;  %v368_v39 = vld [vmem:[%s1518_s30 + $0x78] sm:$0xff] }
  0x1e   : > { %416 = vperm.xlu1 %1298, %v362_v14   ;;  %411 = vperm.xlu0 %1297, %v361_v15   ;;  %v359_v38 = vld [vmem:[%s1518_s30 + $0x30] sm:$0xff]  ;;  %v360_v40 = vld [vmem:[%s1518_s30 + $0x38] sm:$0xff]  ;;  %s1091_s30 = sshll.u32 %s1401_s18, 2  ;;  %s1331_s18 = scalar_lea.vmem %s1680_s5, 2048 }
  0x1f   : > { %1205 = vmatpush3.bf16.msra.mxu0 %v1202_v16  ;;  %1233 = vmatpush3.bf16.msra.mxu1 %v1202_v16  ;;  %p256_p12 = scmp.lt.s32.totalorder %s1091_s30, 7  ;;  %p1332_p13 = scmp.ne.s32.totalorder %s1680_s5, %s1331_s18 }
  0x20   : > { %1207 = vmatprep.subr.bf16.mxu0 %v1206_v21  ;;  %1226 = vmatprep.subr.bf16.mxu1 %v1206_v21 }
  0x21   : > { %s1748_s30 = smov (!%p256_p12, %s1091_s30), 7  ;;  %p1333_p0 = pnand %p1332_p13, %p1481_p4 }
  0x22   : > { %421 = vperm.xlu1 %1298, %v363_v19   ;;  %381 = vperm.xlu0 %1297, %v355_v20   ;;  %s1092_s9 = sshll.u32 %s1748_s30, 3  ;;  %s1413_s30 = smov [#allocation4]  }
  0x23   : > { %1209 = vmatpush3.bf16.msra.mxu0 %v1206_v21  ;;  %1234 = vmatpush3.bf16.msra.mxu1 %v1206_v21  ;;  %s1586_s12 = scalar_lea.vmem %s1731_s0, %s1092_s9  ;;  %p1334_p1 = pneg %p1333_p0 }
  0x24   : > { %1211 = vmatprep.subr.bf16.mxu0 %v1210_v26  ;;  %1227 = vmatprep.subr.bf16.mxu1 %v1210_v26  ;;  %v317_v42 = vld [vmem:[%s1586_s12] sm:$0xff]  ;;  %v319_v45 = vld [vmem:[%s1586_s12 + $0x10] sm:$0xff]  ;;  %v1598_v5 = vld [vmem:[%s1586_s12 + $0x18] sm:$0xff]  ;;  %s1335_s9 = sshll.u32 %s1413_s30, 4  ;;  %s1336_s9 = int_to_ptr.vmem [resolvable:$false] %s1335_s9 }
  0x25   : > { %v322_v43 = vunpack.c.1.s8 %v317_v42  ;;  %v321_v44 = vunpack.c.0.s8 %v317_v42  ;;  %v330_v48 = vunpack.c.1.s8 %v319_v45  ;;  %v329_v49 = vunpack.c.0.s8 %v319_v45  ;;  %v1601_v6 = vld [vmem:[%s1586_s12 + $0x8] sm:$0xff]  ;;  %s1337_s10 = scalar_lea.vmem %s1336_s9, 4096  ;;  %p1338_p2 = scmp.lt.s32.totalorder %s1680_s5, %s1336_s9 }
  0x26   : > { %426 = vperm.xlu1 %1298, %v364_v24   ;;  %386 = vperm.xlu0 %1297, %v356_v25   ;;  %v331_v53 = vunpack.c.2.s8 %v319_v45  ;;  %v323_v54 = vunpack.c.2.s8 %v317_v42  ;;  %v332_v3 = vunpack.c.3.s8 %v319_v45  ;;  %v324_v4 = vunpack.c.3.s8 %v317_v42  ;;  %p1339_p3 = scmp.lt.s32.totalorder %s1337_s10, %s1331_s18 }
  0x27   : > { %1213 = vmatpush3.bf16.msra.mxu0 %v1210_v26  ;;  %1235 = vmatpush3.bf16.msra.mxu1 %v1210_v26  ;;  %v338_v46 = vcvt.s32.f32 %v322_v43  ;;  %v337_v47 = vcvt.s32.f32 %v321_v44  ;;  %v346_v57 = vcvt.s32.f32 %v330_v48  ;;  %v345_v58 = vcvt.s32.f32 %v329_v49 }
  0x28   : > { %1215 = vmatprep.subr.bf16.mxu0 %v1214_v31  ;;  %1228 = vmatprep.subr.bf16.mxu1 %v1214_v31  ;;  %v347_v63 = vcvt.s32.f32 %v331_v53  ;;  %v339_v0 = vcvt.s32.f32 %v323_v54  ;;  %v333_v11 = vunpack.c.0.s8 %v1598_v5  ;;  %v325_v12 = vunpack.c.0.s8 %v1601_v6  ;;  %p1340_p5 = por %p1339_p3, %p1338_p2 }
  0x29   : > { %v348_v15 = vcvt.s32.f32 %v332_v3  ;;  %v340_v16 = vcvt.s32.f32 %v324_v4  ;;  %v334_v25 = vunpack.c.1.s8 %v1598_v5  ;;  %v326_v26 = vunpack.c.1.s8 %v1601_v6 }
  0x2a   : > { %431 = vperm.xlu1 %1298, %v365_v29   ;;  %391 = vperm.xlu0 %1297, %v357_v30   ;;  %v349_v21 = vcvt.s32.f32 %v333_v11  ;;  %v341_v22 = vcvt.s32.f32 %v325_v12  ;;  %v327_v32 = vunpack.c.2.s8 %v1601_v6  ;;  %v336_v45 = vunpack.c.3.s8 %v1598_v5  ;;  %p1341_p6 = pnand %p1340_p5, %p1334_p1 }
  0x2b   : > { %1217 = vmatpush3.bf16.msra.mxu0 %v1214_v31  ;;  %1236 = vmatpush3.bf16.msra.mxu1 %v1214_v31  ;;  %v335_v31 = vunpack.c.2.s8 %v1598_v5  ;;  %v490_v5 = vld [vmem:[#allocation3 + $0x10] sm:$0xff] }
  0x2c   : > { %1219 = vmatprep.subr.bf16.mxu0 %v1218_v36  ;;  %1229 = vmatprep.subr.bf16.mxu1 %v1218_v36  ;;  %v343_v42 = vcvt.s32.f32 %v327_v32  ;;  %v352_v54 = vcvt.s32.f32 %v336_v45  ;;  %v495_v32 = vld [vmem:[#allocation3 + $0x38] sm:$0xff] }
  0x2d   : > { %v351_v41 = vcvt.s32.f32 %v335_v31 }
  0x2e   : > { %436 = vperm.xlu1 %1298, %v366_v34   ;;  %396 = vperm.xlu0 %1297, %v358_v35   ;;  %v350_v35 = vcvt.s32.f32 %v334_v25 }
  0x2f   : > { %1221 = vmatpush3.bf16.msra.mxu0 %v1218_v36  ;;  %1237 = vmatpush3.bf16.msra.mxu1 %v1218_v36  ;;  %v342_v36 = vcvt.s32.f32 %v326_v26 }
  0x32   : > { %441 = vperm.xlu1 %1298, %v367_v37   ;;  %401 = vperm.xlu0 %1297, %v359_v38  }
  0x36   : > { %446 = vperm.xlu1 %1298, %v368_v39   ;;  %406 = vperm.xlu0 %1297, %v360_v40  }
  0x99   : > { %v377_v50 = vpop.permute.xlu1 %376  ;;  %v372_v51 = vpop.permute.xlu0 %371 }
  0x9a   : > { %v450_v55 = vmul.f32 %v377_v50, %v338_v46  ;;  %v449_v56 = vmul.f32 %v372_v51, %v337_v47  ;;  %v328_v46 = vunpack.c.3.s8 %v1601_v6 }
  0x9c   : > { %v473_v59 = vmul.f32 %v1593_v52, %v450_v55  ;;  %v472_v60 = vmul.f32 %v1593_v52, %v449_v56  ;;  %v344_v55 = vcvt.s32.f32 %v328_v46 }
  0x9d   : > { %v417_v61 = vpop.permute.xlu1 %416  ;;  %v412_v62 = vpop.permute.xlu0 %411 }
  0x9e   : > { %v458_v1 = vmul.f32 %v417_v61, %v346_v57  ;;  %v457_v2 = vmul.f32 %v412_v62, %v345_v58  ;;  %506 = vadd.xlane.f32.xlu1 %v473_v59  ;;  %504 = vadd.xlane.f32.xlu0 %v472_v60 }
  0x9f   : > { %1166 = vmatprep.mubr.f32.mxu0 %v472_v60 }
  0xa0   : > { %v1604_v7 = vmul.f32 %v1593_v52, %v458_v1  ;;  %v1607_v8 = vmul.f32 %v1593_v52, %v457_v2  ;;  %1167 = vmatmul.mubr.f32.vlgmr.msra.gmra.mrb[0].mxu0 %v473_v59  ;;  %v488_v1 = vld [vmem:[#allocation3] sm:$0xff] }
  0xa1   : > { %v422_v9 = vpop.permute.xlu1 %421  ;;  %v382_v10 = vpop.permute.xlu0 %381 }
  0xa2   : > { %v459_v13 = vmul.f32 %v422_v9, %v347_v63  ;;  %v451_v14 = vmul.f32 %v382_v10, %v339_v0  ;;  %1178 = vmatprep.mubr.f32.mxu1 %v1607_v8  ;;  %v489_v0 = vld [vmem:[#allocation3 + $0x8] sm:$0xff]  ;;  %v491_v9 = vld [vmem:[#allocation3 + $0x18] sm:$0xff] }
  0xa3   : > { %1179 = vmatmul.mubr.f32.vlgmr.msra.gmra.mrb[0].mxu1 %v1604_v7 }
  0xa4   : > { %v1614_v17 = vmul.f32 %v1593_v52, %v459_v13  ;;  %v474_v18 = vmul.f32 %v1593_v52, %v451_v14 }
  0xa5   : > { %v427_v19 = vpop.permute.xlu1 %426  ;;  %v387_v20 = vpop.permute.xlu0 %386 }
  0xa6   : > { %v460_v23 = vmul.f32 %v427_v19, %v348_v15  ;;  %v452_v24 = vmul.f32 %v387_v20, %v340_v16  ;;  %508 = vadd.xlane.f32.xlu0 %v474_v18  ;;  %1169 = vmatprep.mubr.f32.mxu0 %v474_v18  ;;  %v492_v15 = vld [vmem:[#allocation3 + $0x20] sm:$0xff]  ;;  %v493_v18 = vld [vmem:[#allocation3 + $0x28] sm:$0xff] }
  0xa7   : > { %1181 = vmatprep.mubr.f32.mxu1 %v1614_v17 }
  0xa8   : > { %v483_v27 = vmul.f32 %v1593_v52, %v460_v23  ;;  %v475_v28 = vmul.f32 %v1593_v52, %v452_v24  ;;  %v494_v23 = vld [vmem:[#allocation3 + $0x30] sm:$0xff] }
  0xa9   : > { %v432_v29 = vpop.permute.xlu1 %431  ;;  %v392_v30 = vpop.permute.xlu0 %391 }
  0xaa   : > { %v461_v33 = vmul.f32 %v432_v29, %v349_v21  ;;  %v453_v34 = vmul.f32 %v392_v30, %v341_v22  ;;  %510 = vadd.xlane.f32.xlu0 %v475_v28  ;;  %1170 = vmatmul.mubr.f32.gmra.mrb[2].mxu0 %v475_v28  ;;  %v496_v30 = vld [vmem:[#allocation3 + $0x40] sm:$0xff] }
  0xab   : > { %1182 = vmatmul.mubr.f32.gmra.mrb[2].mxu1 %v483_v27 }
  0xac   : > { %v484_v37 = vmul.f32 %v1593_v52, %v461_v33  ;;  %v476_v38 = vmul.f32 %v1593_v52, %v453_v34 }
  0xad   : > { %v437_v39 = vpop.permute.xlu1 %436  ;;  %v397_v40 = vpop.permute.xlu0 %396 }
  0xae   : > { %v462_v43 = vmul.f32 %v437_v39, %v350_v35  ;;  %v454_v44 = vmul.f32 %v397_v40, %v342_v36  ;;  %1184 = vmatprep.mubr.f32.mxu1 %v484_v37  ;;  %512 = vadd.xlane.f32.xlu1 %v476_v38 }
  0xaf   : > { %1172 = vmatprep.mubr.f32.mxu0 %v476_v38  ;;  %v498_v38 = vld [vmem:[#allocation3 + $0x50] sm:$0xff] }
  0xb0   : > { %v485_v47 = vmul.f32 %v1593_v52, %v462_v43  ;;  %v477_v48 = vmul.f32 %v1593_v52, %v454_v44 }
  0xb1   : > { %v442_v49 = vpop.permute.xlu1 %441  ;;  %v402_v50 = vpop.permute.xlu0 %401 }
  0xb2   : > { %v463_v51 = vmul.f32 %v442_v49, %v351_v41  ;;  %v455_v53 = vmul.f32 %v402_v50, %v343_v42  ;;  %1185 = vmatmul.mubr.f32.gmra.mrb[4].mxu1 %v485_v47  ;;  %514 = vadd.xlane.f32.xlu0 %v477_v48  ;;  %v497_v41 = vld [vmem:[#allocation3 + $0x48] sm:$0xff]  ;;  %v499_v50 = vld [vmem:[#allocation3 + $0x58] sm:$0xff] }
  0xb3   : > { %1173 = vmatmul.mubr.f32.gmra.mrb[4].mxu0 %v477_v48 }
  0xb4   : > { %v486_v56 = vmul.f32 %v1593_v52, %v463_v51  ;;  %v478_v57 = vmul.f32 %v1593_v52, %v455_v53 }
  0xb5   : > { %v447_v58 = vpop.permute.xlu1 %446  ;;  %v407_v59 = vpop.permute.xlu0 %406 }
  0xb6   : > { %v464_v60 = vmul.f32 %v447_v58, %v352_v54  ;;  %v456_v61 = vmul.f32 %v407_v59, %v344_v55  ;;  %1187 = vmatprep.mubr.f32.mxu1 %v486_v56  ;;  %516 = vadd.xlane.f32.xlu1 %v478_v57 }
  0xb7   : > { %1175 = vmatprep.mubr.f32.mxu0 %v478_v57  ;;  %v502_v57 = vld [vmem:[#allocation3 + $0x70] sm:$0xff] }
  0xb8   : > { %v487_v62 = vmul.f32 %v1593_v52, %v464_v60  ;;  %v479_v63 = vmul.f32 %v1593_v52, %v456_v61  ;;  %v501_v60 = vld [vmem:[#allocation3 + $0x68] sm:$0xff] }
  0xba   : > { %1188 = vmatmul.mubr.f32.gmra.mrb[6].mxu1 %v487_v62  ;;  %520 = vadd.xlane.f32.xlu1 %v1607_v8 }
  0xbb   : > { %518 = vadd.xlane.f32.xlu0 %v479_v63  ;;  %1176 = vmatmul.mubr.f32.gmra.mrb[6].mxu0 %v479_v63 }
  0xbe   : > { %524 = vadd.xlane.f32.xlu1 %v1614_v17 }
  0xbf   : > { %522 = vadd.xlane.f32.xlu0 %v1604_v7 }
  0xc2   : > { %528 = vadd.xlane.f32.xlu1 %v484_v37 }
  0xc3   : > { %526 = vadd.xlane.f32.xlu0 %v483_v27 }
  0xc6   : > { %532 = vadd.xlane.f32.xlu1 %v486_v56 }
  0xc7   : > { %530 = vadd.xlane.f32.xlu0 %v485_v47  ;;  %v500_v47 = vld [vmem:[#allocation3 + $0x60] sm:$0xff] }
  0xcb   : > { %534 = vadd.xlane.f32.xlu0 %v487_v62 }
 0x12b   : > { %v507_v2 = vpop.xlane.xlu1 %506  ;;  %v505_v3 = vpop.xlane.xlu0 %504 }
 0x12c   : > { %v537_v4 = vadd.f32 %v507_v2, %v489_v0  ;;  %v536_v52 = vadd.f32 %v505_v3, %v488_v1 }
 0x12e   : > { %554 = vst.msk [vmem:[#allocation3 + $0x8] sm:$0xff] %vm300_vm0, %v537_v4  ;;  %553 = vst.msk [vmem:[#allocation3] sm:$0xff] %vm300_vm0, %v536_v52 }
 0x133   : > { %v509_v6 = vpop.xlane.xlu0 %508 }
 0x134   : > { %v538_v8 = vadd.f32 %v509_v6, %v490_v5  ;;  %v503_v5 = vld [vmem:[#allocation3 + $0x78] sm:$0xff] }
 0x135   : > { %v782_v7 = vld [vmem:[#allocation3 + $0x8] sm:$0xff]  ;;  %v781_v10 = vld [vmem:[#allocation3] sm:$0xff] }
 0x136   : > { %555 = vst.msk [vmem:[#allocation3 + $0x10] sm:$0xff] %vm300_vm0, %v538_v8  ;;  %v798_v11 = vadd.f32 1e-16, %v782_v7  ;;  %v797_v12 = vadd.f32 1e-16, %v781_v10 }
 0x137   : > { %v511_v13 = vpop.xlane.xlu0 %510 }
 0x138   : > { %v539_v14 = vadd.f32 %v511_v13, %v491_v9  ;;  %1299 = vrcp.f32 %v798_v11 }
 0x139   : > { %1301 = vrcp.f32 %v797_v12 }
 0x13a   : > { %556 = vst.msk [vmem:[#allocation3 + $0x18] sm:$0xff] %vm300_vm0, %v539_v14 }
 0x13b   : > { %v513_v16 = vpop.xlane.xlu1 %512 }
 0x13c   : > { %v540_v17 = vadd.f32 %v513_v16, %v492_v15 }
 0x13d   : > { %v783_v19 = vld [vmem:[#allocation3 + $0x10] sm:$0xff] }
 0x13e   : > { %557 = vst.msk [vmem:[#allocation3 + $0x20] sm:$0xff] %vm300_vm0, %v540_v17  ;;  %v799_v20 = vadd.f32 1e-16, %v783_v19 }
 0x13f   : > { %v515_v21 = vpop.xlane.xlu0 %514 }
 0x140   : > { %v541_v22 = vadd.f32 %v515_v21, %v493_v18  ;;  %1303 = vrcp.f32 %v799_v20 }
 0x141   : > { %v784_v24 = vld [vmem:[#allocation3 + $0x18] sm:$0xff] }
 0x142   : > { %v1300_v25 = vpop.eup %1299  ;;  %558 = vst.msk [vmem:[#allocation3 + $0x28] sm:$0xff] %vm300_vm0, %v541_v22  ;;  %v800_v26 = vadd.f32 1e-16, %v784_v24 }
 0x143   : > { %v1302_v27 = vpop.eup %1301  ;;  %v517_v28 = vpop.xlane.xlu1 %516  ;;  %852 = vperm.xlu0 %1297, %v1300_v25  }
 0x144   : > { %v542_v29 = vadd.f32 %v517_v28, %v494_v23  ;;  %847 = vperm.xlu1 %1298, %v1302_v27   ;;  %1305 = vrcp.f32 %v800_v26 }
 0x145   : > { %v785_v31 = vld [vmem:[#allocation3 + $0x20] sm:$0xff] }
 0x146   : > { %559 = vst.msk [vmem:[#allocation3 + $0x30] sm:$0xff] %vm300_vm0, %v542_v29  ;;  %v801_v33 = vadd.f32 1e-16, %v785_v31 }
 0x147   : > { %v521_v34 = vpop.xlane.xlu1 %520 }
 0x148   : > { %v544_v35 = vadd.f32 %v521_v34, %v496_v30  ;;  %v519_v36 = vpop.xlane.xlu0 %518  ;;  %1307 = vrcp.f32 %v801_v33 }
 0x149   : > { %v543_v37 = vadd.f32 %v519_v36, %v495_v32  ;;  %v786_v39 = vld [vmem:[#allocation3 + $0x28] sm:$0xff] }
 0x14a   : > { %v1304_v40 = vpop.eup %1303  ;;  %561 = vst.msk [vmem:[#allocation3 + $0x40] sm:$0xff] %vm300_vm0, %v544_v35  ;;  %v802_v42 = vadd.f32 1e-16, %v786_v39 }
 0x14b   : > { %560 = vst.msk [vmem:[#allocation3 + $0x38] sm:$0xff] %vm300_vm0, %v543_v37  ;;  %v525_v43 = vpop.xlane.xlu1 %524  ;;  %857 = vperm.xlu1 %1298, %v1304_v40  }
 0x14c   : > { %v546_v44 = vadd.f32 %v525_v43, %v498_v38  ;;  %v523_v45 = vpop.xlane.xlu0 %522  ;;  %1309 = vrcp.f32 %v802_v42 }
 0x14d   : > { %v545_v46 = vadd.f32 %v523_v45, %v497_v41  ;;  %v787_v48 = vld [vmem:[#allocation3 + $0x30] sm:$0xff] }
 0x14e   : > { %v1306_v49 = vpop.eup %1305  ;;  %563 = vst.msk [vmem:[#allocation3 + $0x50] sm:$0xff] %vm300_vm0, %v546_v44  ;;  %v803_v51 = vadd.f32 1e-16, %v787_v48 }
 0x14f   : > { %562 = vst.msk [vmem:[#allocation3 + $0x48] sm:$0xff] %vm300_vm0, %v545_v46  ;;  %v529_v53 = vpop.xlane.xlu1 %528  ;;  %862 = vperm.xlu1 %1298, %v1306_v49  }
 0x150   : > { %v548_v54 = vadd.f32 %v529_v53, %v500_v47  ;;  %v527_v55 = vpop.xlane.xlu0 %526  ;;  %1311 = vrcp.f32 %v803_v51 }
 0x151   : > { %v547_v56 = vadd.f32 %v527_v55, %v499_v50  ;;  %v789_v58 = vld [vmem:[#allocation3 + $0x40] sm:$0xff] }
 0x152   : > { %v1308_v59 = vpop.eup %1307  ;;  %565 = vst.msk [vmem:[#allocation3 + $0x60] sm:$0xff] %vm300_vm0, %v548_v54  ;;  %v805_v61 = vadd.f32 1e-16, %v789_v58  ;;  %v788_v62 = vld [vmem:[#allocation3 + $0x38] sm:$0xff] }
 0x153   : > { %564 = vst.msk [vmem:[#allocation3 + $0x58] sm:$0xff] %vm300_vm0, %v547_v56  ;;  %v533_v63 = vpop.xlane.xlu1 %532  ;;  %867 = vperm.xlu0 %1297, %v1308_v59   ;;  %v804_v0 = vadd.f32 1e-16, %v788_v62 }
 0x154   : > { %v550_v1 = vadd.f32 %v533_v63, %v502_v57  ;;  %v531_v2 = vpop.xlane.xlu0 %530  ;;  %1313 = vrcp.f32 %v805_v61 }
 0x155   : > { %v549_v3 = vadd.f32 %v531_v2, %v501_v60  ;;  %1315 = vrcp.f32 %v804_v0  ;;  %v791_v4 = vld [vmem:[#allocation3 + $0x50] sm:$0xff] }
 0x156   : > { %v1310_v52 = vpop.eup %1309  ;;  %567 = vst.msk [vmem:[#allocation3 + $0x70] sm:$0xff] %vm300_vm0, %v550_v1  ;;  %v807_v6 = vadd.f32 1e-16, %v791_v4  ;;  %v790_v8 = vld [vmem:[#allocation3 + $0x48] sm:$0xff] }
 0x157   : > { %566 = vst.msk [vmem:[#allocation3 + $0x68] sm:$0xff] %vm300_vm0, %v549_v3  ;;  %872 = vperm.xlu1 %1298, %v1310_v52   ;;  %v806_v9 = vadd.f32 1e-16, %v790_v8 }
 0x158   : > { %v535_v7 = vpop.xlane.xlu0 %534  ;;  %1317 = vrcp.f32 %v807_v6 }
 0x159   : > { %v551_v10 = vadd.f32 %v535_v7, %v503_v5  ;;  %1319 = vrcp.f32 %v806_v9  ;;  %v793_v11 = vld [vmem:[#allocation3 + $0x60] sm:$0xff] }
 0x15a   : > { %v1312_v12 = vpop.eup %1311  ;;  %v809_v13 = vadd.f32 1e-16, %v793_v11  ;;  %v792_v14 = vld [vmem:[#allocation3 + $0x58] sm:$0xff] }
 0x15b   : > { %568 = vst.msk [vmem:[#allocation3 + $0x78] sm:$0xff] %vm300_vm0, %v551_v10  ;;  %877 = vperm.xlu0 %1297, %v1312_v12   ;;  %v808_v15 = vadd.f32 1e-16, %v792_v14 }
 0x15c   : > { %1321 = vrcp.f32 %v809_v13 }
 0x15d   : > { %1323 = vrcp.f32 %v808_v15  ;;  %v795_v16 = vld [vmem:[#allocation3 + $0x70] sm:$0xff] }
 0x15e   : > { %v1314_v17 = vpop.eup %1313  ;;  %v811_v18 = vadd.f32 1e-16, %v795_v16  ;;  %v794_v19 = vld [vmem:[#allocation3 + $0x68] sm:$0xff] }
 0x15f   : > { %v1316_v20 = vpop.eup %1315  ;;  %887 = vperm.xlu0 %1297, %v1314_v17   ;;  %v810_v21 = vadd.f32 1e-16, %v794_v19 }
 0x160   : > { %882 = vperm.xlu1 %1298, %v1316_v20   ;;  %1325 = vrcp.f32 %v811_v18 }
 0x161   : > { %1327 = vrcp.f32 %v810_v21 }
 0x162   : > { %v1318_v22 = vpop.eup %1317  ;;  %v796_v23 = vld [vmem:[#allocation3 + $0x78] sm:$0xff] }
 0x163   : > { %v1320_v24 = vpop.eup %1319  ;;  %897 = vperm.xlu0 %1297, %v1318_v22   ;;  %v812_v25 = vadd.f32 1e-16, %v796_v23 }
 0x164   : > { %892 = vperm.xlu1 %1298, %v1320_v24  }
 0x165   : > { %1329 = vrcp.f32 %v812_v25 }
 0x166   : > { %v1322_v26 = vpop.eup %1321 }
 0x167   : > { %v1324_v27 = vpop.eup %1323  ;;  %907 = vperm.xlu0 %1297, %v1322_v26  }
 0x168   : > { %902 = vperm.xlu1 %1298, %v1324_v27  }
 0x16a   : > { %v1326_v28 = vpop.eup %1325 }
 0x16b   : > { %v1328_v29 = vpop.eup %1327  ;;  %917 = vperm.xlu0 %1297, %v1326_v28  }
 0x16c   : > { %912 = vperm.xlu1 %1298, %v1328_v29  }
 0x16f   : > { %v1330_v30 = vpop.eup %1329 }
 0x170   : > { %922 = vperm.xlu1 %1298, %v1330_v30  }
 0x173   : > { %v1168_v31 = vpop.f32.mrb[0].mxu0 }
 0x174   : > { %v667_v32 = vpop.f32.mrb[1].mxu0 }
 0x176   : > { %v1180_v33 = vpop.f32.mrb[0].mxu1 }
 0x177   : > { %v707_v34 = vpop.f32.mrb[1].mxu1 }
 0x17d   : > { %v1171_v35 = vpop.f32.mrb[2].mxu0 }
 0x17e   : > { %v677_v36 = vpop.f32.mrb[3].mxu0  ;;  %v1183_v37 = vpop.f32.mrb[2].mxu1 }
 0x17f   : > { %v717_v38 = vpop.f32.mrb[3].mxu1 }
 0x185   : > { %v1186_v39 = vpop.f32.mrb[4].mxu1 }
 0x186   : > { %v1174_v40 = vpop.f32.mrb[4].mxu0  ;;  %v727_v41 = vpop.f32.mrb[5].mxu1 }
 0x187   : > { %v687_v42 = vpop.f32.mrb[5].mxu0 }
 0x18d   : > { %v1189_v43 = vpop.f32.mrb[6].mxu1 }
 0x18e   : > { %v1177_v44 = vpop.f32.mrb[6].mxu0  ;;  %v737_v45 = vpop.f32.mrb[7].mxu1 }
 0x18f   : > { %v697_v46 = vpop.f32.mrb[7].mxu0 }
 0x1c2   : > { %v853_v47 = vpop.permute.xlu0 %852 }
 0x1c3   : > { %v848_v48 = vpop.permute.xlu1 %847  ;;  %v926_v49 = vmul.f32 %v1168_v31, %v853_v47 }
 0x1c4   : > { %v925_v50 = vmul.f32 %v848_v48, %v667_v32 }
 0x1c5   : > { %942 = vst [vmem:[%s1656_s24 + $0x8] sm:$0xff] %v926_v49 }
 0x1c6   : > { %941 = vst [vmem:[%s1656_s24] sm:$0xff] %v925_v50 }
 0x1ca   : > { %v858_v51 = vpop.permute.xlu1 %857 }
 0x1cb   : > { %v927_v53 = vmul.f32 %v858_v51, %v677_v36 }
 0x1cd   : > { %943 = vst [vmem:[%s1656_s24 + $0x10] sm:$0xff] %v927_v53 }
 0x1ce   : > { %v863_v54 = vpop.permute.xlu1 %862 }
 0x1cf   : > { %v928_v55 = vmul.f32 %v1171_v35, %v863_v54 }
 0x1d1   : > { %944 = vst [vmem:[%s1656_s24 + $0x18] sm:$0xff] %v928_v55 }
 0x1d2   : > { %v868_v56 = vpop.permute.xlu0 %867 }
 0x1d3   : > { %v929_v57 = vmul.f32 %v868_v56, %v687_v42 }
 0x1d5   : > { %945 = vst [vmem:[%s1656_s24 + $0x20] sm:$0xff] %v929_v57 }
 0x1d6   : > { %v873_v58 = vpop.permute.xlu1 %872 }
 0x1d7   : > { %v930_v59 = vmul.f32 %v1174_v40, %v873_v58 }
 0x1d9   : > { %946 = vst [vmem:[%s1656_s24 + $0x28] sm:$0xff] %v930_v59 }
 0x1da   : > { %v878_v60 = vpop.permute.xlu0 %877 }
 0x1db   : > { %v931_v61 = vmul.f32 %v878_v60, %v697_v46 }
 0x1dd   : > { %947 = vst [vmem:[%s1656_s24 + $0x30] sm:$0xff] %v931_v61 }
 0x1de   : > { %v888_v62 = vpop.permute.xlu0 %887 }
 0x1df   : > { %v883_v63 = vpop.permute.xlu1 %882  ;;  %v933_v0 = vmul.f32 %v888_v62, %v707_v34 }
 0x1e0   : > { %v932_v1 = vmul.f32 %v1177_v44, %v883_v63 }
 0x1e1   : > { %949 = vst [vmem:[%s1656_s24 + $0x40] sm:$0xff] %v933_v0 }
 0x1e2   : > { %948 = vst [vmem:[%s1656_s24 + $0x38] sm:$0xff] %v932_v1  ;;  %v898_v2 = vpop.permute.xlu0 %897 }
 0x1e3   : > { %v893_v3 = vpop.permute.xlu1 %892  ;;  %v935_v4 = vmul.f32 %v898_v2, %v717_v38 }
 0x1e4   : > { %v934_v52 = vmul.f32 %v1180_v33, %v893_v3 }
 0x1e5   : > { %951 = vst [vmem:[%s1656_s24 + $0x50] sm:$0xff] %v935_v4 }
 0x1e6   : > { %950 = vst [vmem:[%s1656_s24 + $0x48] sm:$0xff] %v934_v52  ;;  %v908_v5 = vpop.permute.xlu0 %907 }
 0x1e7   : > { %v903_v6 = vpop.permute.xlu1 %902  ;;  %v937_v8 = vmul.f32 %v908_v5, %v727_v41 }
 0x1e8   : > { %v936_v9 = vmul.f32 %v1183_v37, %v903_v6 }
 0x1e9   : > { %953 = vst [vmem:[%s1656_s24 + $0x60] sm:$0xff] %v937_v8 }
 0x1ea   : > { %952 = vst [vmem:[%s1656_s24 + $0x58] sm:$0xff] %v936_v9  ;;  %v918_v7 = vpop.permute.xlu0 %917 }
 0x1eb   : > { %v913_v10 = vpop.permute.xlu1 %912  ;;  %v939_v11 = vmul.f32 %v918_v7, %v737_v45 }
 0x1ec   : > { %v938_v12 = vmul.f32 %v1186_v39, %v913_v10 }
 0x1ed   : > { %955 = vst [vmem:[%s1656_s24 + $0x70] sm:$0xff] %v939_v11 }
 0x1ee   : > { %954 = vst [vmem:[%s1656_s24 + $0x68] sm:$0xff] %v938_v12 }
 0x1ef   : > { %v923_v13 = vpop.permute.xlu1 %922 }
 0x1f0   : > { %v940_v14 = vmul.f32 %v1189_v43, %v923_v13 }
 0x1f2   : > { %956 = vst [vmem:[%s1656_s24 + $0x78] sm:$0xff] %v940_v14 }
 0x1f3   : > { %1344 = shalt.err (!%p1341_p6)
}
 0x1f4   : > { %s1345_s11 = scalar_lea.hbm %s1678_s7, 2048  ;;  %s1349_s14 = scalar_lea.hbm %s1735_s4, 4096 }
 0x1f5   : > { %p1346_p7 = scmp.ne.s32.totalorder %s1678_s7, %s1345_s11  ;;  %p1350_p11 = scmp.lt.u32.totalorder %s1678_s7, %s1735_s4 }
 0x1f6   : > { %p1351_p12 = scmp.lt.u32.totalorder %s1349_s14, %s1345_s11  ;;  %p1353_p0 = scmp.lt.u32.totalorder %s1345_s11, %s1678_s7 }
 0x1f7   : > { %p1347_p9 = pnand %p1346_p7, %p1481_p4 }
 0x1f8   : > { %p1352_p13 = por %p1351_p12, %p1350_p11 }
 0x1f9   : > { %p1348_p10 = pneg %p1347_p9 }
 0x1fa   : > { %p1354_p1 = por %p1353_p0, %p1352_p13 }
 0x1fc   : > { %p1355_p2 = pnand %p1354_p1, %p1348_p10 }
 0x1fe   : > { %1358 = shalt.err (!%p1355_p2)
}
 0x1ff   : > { %s1414_s24 = smov 128   ;;  %s1415_s26 = smov 8  }
 0x200   : > { %1238 = dma.vmem_to_hbm [thread:$0]  (%p1481_p4), %s1680_s5, 2048, %s1678_s7, %s1685_s8, %s1414_s24, %s1414_s24, %s1415_s26  }
 0x201 PF: > { %p1244_p3 = scmp.ge.s32.totalorder %s1409_s20, 2  ;;  %s986_s6 = sand.u32 1, %s1389_s15  }
 0x202   : > { %s987_s29 = scalar_lea.sflag [#allocation5], %s986_s6 }
 0x203   : > { %p1241_p5 = pnand %p1244_p3, %p1488_p8 }
 0x205   : > { %1384 = dma.done.wait (!%p1241_p5), %s987_s29, 2048  }
 0x206   : > { %1386 = vsyncadd (!%p1241_p5), %s987_s29, 4294965248  ;;  %s17_s20 = sadd.s32 1, %s1409_s20   ;;  %s1738_s15 = smov %s1393_s16 }
 0x207   : > { %p14_p6 = scmp.ge.s32.totalorder %s17_s20, 4   ;;  %s1739_s16 = smov %s1397_s17 }
 0x208   : > { %s1740_s17 = smov %s1494_s28  ;;  %s1741_s18 = smov %s1405_s19 }
 0x209   : > { %s1742_s19 = smov %s1744_s23  ;;  %16 = sbr.rel (!%p14_p6) target bundleno = 4 (0x4), region = 88 }
 0x210   :  { %992 = vsyncpa [#allocation5], 1 }
 0x211   :  { %994 = vsyncpa [#allocation5 + $0x1], 1 }

</bundles_post_ra>
